<compile_context>
chip_gen: v5e
topology: v5e:2x2
jax: 0.10.0
libtpu: 0.0.40
codegen_flags: <defaults>
</compile_context>

<pallas_src>
import jax
import jax.numpy as jnp
from jax.experimental import pallas as pl
from jax.experimental.pallas import tpu as pltpu


def _round_up(n, m):
    return ((n + m - 1) // m) * m


def _layer_layout(all_dims):
    """Row layout of the packed parameter slab.

    Layer l occupies:
      rows [row_off, row_off + d_in)                 : W_l   (d_in, d_out)
      row  [row_off + w_rows, row_off + w_rows + 1)  : b_l   (1, d_out)
    with w_rows = round_up(d_in, 8), so every slice start is sublane-aligned.
    """
    meta = []
    row = 0
    for d_in, d_out in zip(all_dims[:-1], all_dims[1:]):
        w_rows = _round_up(d_in, 8)
        meta.append((row, w_rows, d_in, d_out))
        row += w_rows + 8  # 8 padded rows for the bias (keeps 8-alignment)
    total_rows = _round_up(row, 8)
    max_out = max(all_dims[1:])
    return meta, total_rows, max_out


def pack_params(params, all_dims):
    """Pack [w0, b0, w1, b1, ...] (w: [in,out], b: [1,out]) into one f32 slab."""
    meta, total_rows, max_out = _layer_layout(all_dims)
    slab = jnp.zeros((total_rows, max_out), jnp.float32)
    for l, (row_off, w_rows, d_in, d_out) in enumerate(meta):
        w = params[2 * l].astype(jnp.float32)
        b = params[2 * l + 1].reshape(1, d_out).astype(jnp.float32)
        slab = slab.at[row_off:row_off + d_in, :d_out].set(w)
        slab = slab.at[row_off + w_rows:row_off + w_rows + 1, :d_out].set(b)
    return slab, meta


def _make_priornet_kernel(meta):
    num_layers = len(meta)

    def kernel(x_ref, p_ref, out_ref):
        h = x_ref[...].astype(jnp.float32)
        for l, (row_off, w_rows, d_in, d_out) in enumerate(meta):
            # Static, sublane-aligned slices of the resident parameter slab.
            w = p_ref[row_off:row_off + d_in, :d_out]
            b = p_ref[row_off + w_rows:row_off + w_rows + 1, :d_out]
            # MXU matmul (f32 accumulate) + VPU bias add; EUP tanh for hidden.
            h = jnp.dot(h, w, preferred_element_type=jnp.float32) + b
            if l < num_layers - 1:
                h = jnp.tanh(h)
        # Single lane-dense combined store (mu | logvar); split in the wrapper.
        out_ref[...] = h.astype(out_ref.dtype)

    return kernel


def prior_net_forward(x, params, latent_size, *, block_rows=256):
    """params: flat list [w0, b0, ..., w_out, b_out]. Returns (mu, logvar)."""
    batch, x_size = x.shape
    all_dims = [x_size] + [params[2 * l].shape[1] for l in range(len(params) // 2)]
    out_width = all_dims[-1]
    assert out_width == 2 * latent_size

    slab, meta = pack_params(params, all_dims)
    kernel = _make_priornet_kernel(meta)

    tm = min(block_rows, batch)
    assert tm == batch or tm % 8 == 0, "batch tile must be sublane-aligned"
    grid = (pl.cdiv(batch, tm),)

    # Advisory cost so XLA can schedule/overlap this small custom call.
    flops = 2 * batch * sum(di * do for di, do in zip(all_dims[:-1], all_dims[1:]))
    transcendentals = batch * sum(all_dims[1:-1])
    bytes_accessed = 4 * (batch * x_size + int(slab.size) + batch * out_width)

    out = pl.pallas_call(
        kernel,
        out_shape=jax.ShapeDtypeStruct((batch, out_width), x.dtype),
        grid=grid,
        in_specs=[
            pl.BlockSpec((tm, x_size), lambda i: (i, 0)),
            # Whole slab, same block every step -> stays VMEM resident, no re-DMA.
            pl.BlockSpec(slab.shape, lambda i: (0, 0)),
        ],
        out_specs=pl.BlockSpec((tm, out_width), lambda i: (i, 0)),
        compiler_params=pltpu.CompilerParams(
            dimension_semantics=("parallel",),   # shard batch grid across TCs (v7x)
            vmem_limit_bytes=32 * 1024 * 1024,   # explicit budget; fits v7x 64 MiB
        ),
        cost_estimate=pl.CostEstimate(
            flops=flops,
            transcendentals=transcendentals,
            bytes_accessed=bytes_accessed,
        ),
    )(x, slab)

    # torch.split(predict, [latent_size, latent_size], dim=1) -- cheap XLA slice.
    return out[:, :latent_size], out[:, latent_size:]


def init_prior_net_params(key, x_size, latent_size, dims):
    """Deterministic synthetic init matching PriorNet.__init__ layer shapes."""
    all_dims = [x_size] + list(dims) + [latent_size * 2]
    params = []
    for d_in, d_out in zip(all_dims[:-1], all_dims[1:]):
        key, kw, kb = jax.random.split(key, 3)
        scale = 1.0 / jnp.sqrt(jnp.float32(d_in))
        # Stored as [in, out] (pre-transposed torch Linear weight).
        w = jax.random.uniform(kw, (d_in, d_out), jnp.float32, -scale, scale)
        b = jax.random.uniform(kb, (1, d_out), jnp.float32, -scale, scale)
        params += [w, b]
    return params


def prior_net_reference(x, params, latent_size):
    num_layers = len(params) // 2
    h = x.astype(jnp.float32)
    for i in range(num_layers - 1):
        h = jnp.tanh(h @ params[2 * i] + params[2 * i + 1])
    out = h @ params[-2] + params[-1]
    return out[:, :latent_size], out[:, latent_size:]


if __name__ == "__main__":
    # Small shapes consistent with the module: input [B, x_size].
    batch = 16
    x_size = 32
    dims = [32, 32]       # two hidden tanh layers
    latent_size = 8       # output layer width = 2 * latent_size = 16

    key = jax.random.PRNGKey(0)
    key, kx = jax.random.split(key)
    x = jax.random.normal(kx, (batch, x_size), jnp.float32)
    params = init_prior_net_params(key, x_size, latent_size, dims)

    # block_rows=8 -> grid of 2 batch tiles (exercises the pipelined batch grid).
    mu, logvar = prior_net_forward(x, params, latent_size, block_rows=8)
    mu, logvar = jax.block_until_ready((mu, logvar))

    mu_ref, logvar_ref = prior_net_reference(x, params, latent_size)
    assert mu.shape == (batch, latent_size)
    assert logvar.shape == (batch, latent_size)
    assert jnp.allclose(mu, mu_ref, atol=1e-5, rtol=1e-5)
    assert jnp.allclose(logvar, logvar_ref, atol=1e-5, rtol=1e-5)

    print("KERNEL_OK")
</pallas_src>

<mosaic_0001>
module attributes {stable_mosaic.version = 11 : i64} {
  func.func @kernel(%arg0: i32, %arg1: memref<8x32xf32, #tpu.memory_space<vmem>>, %arg2: memref<120x32xf32, #tpu.memory_space<vmem>>, %arg3: memref<8x16xf32, #tpu.memory_space<vmem>>) attributes {dimension_semantics = [#tpu.dimension_semantics<parallel>], iteration_bounds = array<i64: 2>, scalar_prefetch = 0 : i64, scratch_operands = 0 : i64, tpu.core_type = #tpu.core_type<tc>, window_params = [{transform_indices = @transform_0, window_bounds = array<i64: 8, 32>}, {pipeline_mode = #tpu.pipeline_mode<synchronous>, transform_indices = @transform_1, window_bounds = array<i64: 120, 32>}, {transform_indices = @transform_2, window_bounds = array<i64: 8, 16>}]} {
    %c0 = arith.constant 0 : index
    %c0_0 = arith.constant 0 : index
    %0 = vector.load %arg1[%c0, %c0_0] : memref<8x32xf32, #tpu.memory_space<vmem>>, vector<8x32xf32>
    %c0_1 = arith.constant 0 : index
    %c0_2 = arith.constant 0 : index
    %1 = vector.load %arg2[%c0_1, %c0_2] : memref<120x32xf32, #tpu.memory_space<vmem>>, vector<32x32xf32>
    %c32 = arith.constant 32 : index
    %c0_3 = arith.constant 0 : index
    %2 = vector.load %arg2[%c32, %c0_3] : memref<120x32xf32, #tpu.memory_space<vmem>>, vector<1x32xf32>
    %cst = arith.constant dense<0.000000e+00> : vector<8x32xf32>
    %3 = tpu.matmul %0, %1, %cst {dimension_numbers = #tpu.dot_dimension_numbers<[1], [0], [0], [1], [0, 0, 1, 1], [], []>} : vector<8x32xf32>, vector<32x32xf32>, vector<8x32xf32> -> vector<8x32xf32>
    %4 = vector.broadcast %2 : vector<1x32xf32> to vector<8x32xf32>
    %5 = arith.addf %3, %4 : vector<8x32xf32>
    %6 = math.tanh %5 : vector<8x32xf32>
    %c40 = arith.constant 40 : index
    %c0_4 = arith.constant 0 : index
    %7 = vector.load %arg2[%c40, %c0_4] : memref<120x32xf32, #tpu.memory_space<vmem>>, vector<32x32xf32>
    %c72 = arith.constant 72 : index
    %c0_5 = arith.constant 0 : index
    %8 = vector.load %arg2[%c72, %c0_5] : memref<120x32xf32, #tpu.memory_space<vmem>>, vector<1x32xf32>
    %cst_6 = arith.constant dense<0.000000e+00> : vector<8x32xf32>
    %9 = tpu.matmul %6, %7, %cst_6 {dimension_numbers = #tpu.dot_dimension_numbers<[1], [0], [0], [1], [0, 0, 1, 1], [], []>} : vector<8x32xf32>, vector<32x32xf32>, vector<8x32xf32> -> vector<8x32xf32>
    %10 = vector.broadcast %8 : vector<1x32xf32> to vector<8x32xf32>
    %11 = arith.addf %9, %10 : vector<8x32xf32>
    %12 = math.tanh %11 : vector<8x32xf32>
    %c80 = arith.constant 80 : index
    %c0_7 = arith.constant 0 : index
    %13 = vector.load %arg2[%c80, %c0_7] : memref<120x32xf32, #tpu.memory_space<vmem>>, vector<32x16xf32>
    %c112 = arith.constant 112 : index
    %c0_8 = arith.constant 0 : index
    %14 = vector.load %arg2[%c112, %c0_8] : memref<120x32xf32, #tpu.memory_space<vmem>>, vector<1x16xf32>
    %cst_9 = arith.constant dense<0.000000e+00> : vector<8x16xf32>
    %15 = tpu.matmul %12, %13, %cst_9 {dimension_numbers = #tpu.dot_dimension_numbers<[1], [0], [0], [1], [0, 0, 1, 1], [], []>} : vector<8x32xf32>, vector<32x16xf32>, vector<8x16xf32> -> vector<8x16xf32>
    %16 = vector.broadcast %14 : vector<1x16xf32> to vector<8x16xf32>
    %17 = arith.addf %15, %16 : vector<8x16xf32>
    %c0_10 = arith.constant 0 : index
    %c0_11 = arith.constant 0 : index
    %18 = vector.load %arg3[%c0_10, %c0_11] : memref<8x16xf32, #tpu.memory_space<vmem>>, vector<8x16xf32>
    tpu.vector_store %arg3[%c0_10, %c0_11], %17 {strides = array<i32>} : memref<8x16xf32, #tpu.memory_space<vmem>>, vector<8x16xf32>,
    return
  }
  func.func @transform_0(%arg0: i32) -> (i32, i32) {
    %c0_i32 = arith.constant 0 : i32
    %c0_i32_0 = arith.constant 0 : i32
    return %arg0, %c0_i32 : i32, i32
  }
  func.func @transform_1(%arg0: i32) -> (i32, i32) {
    %c0_i32 = arith.constant 0 : i32
    %c0_i32_0 = arith.constant 0 : i32
    %c0_i32_1 = arith.constant 0 : i32
    return %c0_i32, %c0_i32_0 : i32, i32
  }
  func.func @transform_2(%arg0: i32) -> (i32, i32) {
    %c0_i32 = arith.constant 0 : i32
    %c0_i32_0 = arith.constant 0 : i32
    return %arg0, %c0_i32 : i32, i32
  }
}

</mosaic_0001>

<bundles_post_ra>
// kernel: tpu_custom_call.1
= control target key start
LH: loop header
LB: loop body
LE: loop exit
PB: predicated region body
PF: predicated region fallthrough
CT: control target
= control target key end

     0   :  { %7 = vsyncpa [#allocation3], 0  ;;  %s578_s0 = inlined_call_operand.vmem [shape: f32[16,32], index: 0, kind: input, shape index: {}]   ;;  %s579_s1 = inlined_call_operand.vmem [shape: f32[120,32], index: 1, kind: input, shape index: {}]   ;;  %s580_s2 = inlined_call_operand.hbm [shape: f32[16,16], index: 2, kind: output, shape index: {}]  }
   0x1   :  { %9 = vsyncpa [#allocation3 + $0x1], 0  ;;  %s445_s9 = smov 0   ;;  %s447_s10 = smov 0  }
   0x2   :  { %s449_s11 = smov 0   ;;  %s451_s12 = smov 0  }
   0x3 LB: > { %s466_s13 = sadd.s32 4294967295, %s428_s12   ;;  %s307_s14 = sadd.s32 4294967294, %s428_s12   ;;  %s428_s12 = sphi %s451_s12, %s586_s12   ;;  %s424_s11 = sphi %s449_s11, %s585_s11   ;;  %s420_s10 = sphi %s447_s10, %s584_s10   ;;  %s416_s9 = sphi %s445_s9, %s583_s9  }
   0x4   : > { %s470_s15 = sadd.s32 1, %s428_s12   ;;  %s69_s16 = sadd.s32 1, %s424_s11 }
   0x5   : > { %s66_s17 = ssub.s32 %s428_s12, %s470_s15  ;;  %p79_p0 = scmp.ne.s32.totalorder %s424_s11, %s420_s10 }
   0x6   : > { %p67_p1 = scmp.eq.s32.totalorder %s66_s17, 0  ;;  %p80_p2 = scmp.eq.s32.totalorder %s466_s13, 1 }
   0x7   : > { %p85_p3 = scmp.ne.s32.totalorder %s420_s10, %s416_s9  ;;  %p86_p4 = scmp.eq.s32.totalorder %s307_s14, 1 }
   0x8   : > { %s481_s18 = scalar_select %p67_p1, %s424_s11, %s69_s16  }
   0x9   : > { %p483_p5 = por %p80_p2, %p79_p0  ;;  %p487_p6 = por %p86_p4, %p85_p3 }
   0xa   : > { %p310_p7 = scmp.ge.s32.totalorder %s428_s12, 1  ;;  %p114_p8 = scmp.lt.s32.totalorder %s428_s12, 3 }
   0xc   : > { %p115_p9 = pnand %p310_p7, %p114_p8 }
   0xd   : > { %p135_p10 = scmp.lt.s32.totalorder (!%p115_p9), %s466_s13, 1  ;;  %s132_s7 = sand.u32 (!%p115_p9), 1, %s420_s10  }
   0xe   : > { %118 = sbr.rel (%p115_p9) target bundleno = 434 (0x1b2), region = 28  ;;  %s311_s8 = sshll.u32 (!%p115_p9), %s132_s7, 3 }
   0xf   : > { %s317_s14 = sshll.u32 (!%p115_p9), %s466_s13, 3  ;;  %s134_s24 = scalar_lea.vmem (!%p115_p9), [#allocation2], %s311_s8 }
  0x10   : > { %s243_s21 = scalar_lea.hbm (!%p115_p9), %s580_s2, %s317_s14  ;;  %s245_s25 = sshll.u32 (!%p115_p9), %s134_s24, 4  ;;  %s246_s25 = int_to_ptr.vmem [resolvable:$true] %s245_s25 }
  0x11   : > { %s247_s26 = sshll.u32 (!%p115_p9), %s243_s21, 4  ;;  %s386_s3 = scalar_lea.hbm (!%p115_p9), %s580_s2, 16  ;;  %s248_s26 = int_to_ptr.hbm [resolvable:$true] %s247_s26 }
  0x13   : > { %v143_v0 = vld [vmem:[%s579_s1 + $0x18] sm:$0xff]  ;;  %v142_v1 = vld [vmem:[%s579_s1 + $0x10] sm:$0xff]  ;;  %v141_v2 = vld [vmem:[%s579_s1 + $0x8] sm:$0xff]  ;;  %s136_s27 = scalar_select %p135_p10, %s466_s13, 1  ;;  %vm146_vm0 = vcmask 261120   ;;  %vm230_vm1 = vcmask 130048  }
  0x14   : > { %162 = vmatpush.msra.mxu0 %v143_v0  ;;  %v140_v3 = vld [vmem:[%s579_s1] sm:$0xff]  ;;  %v173_v6 = vld [vmem:[%s579_s1 + $0x38] sm:$0xff]  ;;  %v172_v7 = vld [vmem:[%s579_s1 + $0x30] sm:$0xff]  ;;  %s380_s13 = sshra.s32 %s248_s26, 4  ;;  %s381_s13 = int_to_ptr.hbm [resolvable:$true] %s380_s13 }
  0x15   : > { %s312_s30 = sshll.u32 %s136_s27, 3  ;;  %v174_v5 = vld [vmem:[%s579_s1 + $0x40] sm:$0xff]  ;;  %v171_v8 = vld [vmem:[%s579_s1 + $0x28] sm:$0xff]  ;;  %v202_v15 = vld [vmem:[%s579_s1 + $0x58] sm:$0xff]  ;;  %s233_s27 = scalar_lea.sflag [#allocation3], %s132_s7 }
  0x16   : > { %163 = vmatpush.msra.mxu0 %v142_v1  ;;  %s138_s5 = scalar_lea.vmem %s578_s0, %s312_s30  ;;  %192 = vmatpush.msra.mxu1 %v174_v5  ;;  %v359_v9 = vld [vmem:[%s579_s1 + $0x20] ss:$0 sm:$0xff]  ;;  %v204_v13 = vld [vmem:[%s579_s1 + $0x68] sm:$0xff]  ;;  %v201_v16 = vld [vmem:[%s579_s1 + $0x50] sm:$0xff]  ;;  %s382_s28 = scalar_lea.hbm %s381_s13, 8 }
  0x17   : > { %v139_v4 = vld [vmem:[%s138_s5] sm:$0xff]  ;;  %222 = vmatpush.msra.mxu2 %v204_v13  ;;  %v360_v17 = vld [vmem:[%s579_s1 + $0x48] ss:$0 sm:$0xff]  ;;  %v361_v21 = vld [vmem:[%s579_s1 + $0x70] ss:$0 sm:$0xff]  ;;  %p383_p11 = scmp.ne.s32.totalorder %s381_s13, %s382_s28  ;;  %p387_p0 = scmp.lt.s32.totalorder %s381_s13, %s580_s2 }
  0x18   : > { %164 = vmatpush.msra.mxu0 %v141_v2  ;;  %193 = vmatpush.msra.mxu1 %v173_v6  ;;  %v203_v14 = vld [vmem:[%s579_s1 + $0x60] sm:$0xff]  ;;  %p388_p1 = scmp.lt.s32.totalorder %s386_s3, %s382_s28 }
  0x19   : > { %223 = vmatpush.msra.mxu2 %v203_v14  ;;  %p384_p12 = pnand %p383_p11, %p483_p5 }
  0x1a   : > { %165 = vmatpush.msra.mxu0 %v140_v3  ;;  %194 = vmatpush.msra.mxu1 %v172_v7  ;;  %p389_p2 = por %p388_p1, %p387_p0 }
  0x1b   : > { %313 = vmatmul.msk.f32.vlgmr.msra.gmra.mxu0 %vm146_vm0, %v139_v4  ;;  %224 = vmatpush.msra.mxu2 %v202_v15  ;;  %p385_p13 = pneg %p384_p12 }
  0x1c   : > { %195 = vmatpush.msra.mxu1 %v171_v8 }
  0x1d   : > { %225 = vmatpush.msra.mxu2 %v201_v16  ;;  %p390_p3 = pnand %p389_p2, %p385_p13 }
  0x98   : > { %v167_v10 = vpop.f32.mrf.mxu0 }
  0x99   : > { %v168_v11 = vadd.f32 %v359_v9, %v167_v10 }
  0x9b   : > { %362 = vtanh.f32 %v168_v11 }
  0xa1   : > { %v363_v12 = vpop.eup %362 }
  0xa2   : > { %314 = vmatmul.msk.f32.vlgmr.msra.gmra.mxu1 %vm146_vm0, %v363_v12 }
 0x11f   : > { %v197_v18 = vpop.f32.mrf.mxu1 }
 0x120   : > { %v198_v19 = vadd.f32 %v360_v17, %v197_v18 }
 0x122   : > { %364 = vtanh.f32 %v198_v19 }
 0x128   : > { %v365_v20 = vpop.eup %364 }
 0x129   : > { %315 = vmatmul.msk.f32.vlgmr.msra.gmra.mxu2 %vm146_vm0, %v365_v20 }
 0x1ac   : > { %v227_v22 = vpop.f32.mrf.mxu2 }
 0x1ad   : > { %v228_v23 = vadd.f32 %v361_v21, %v227_v22 }
 0x1af   : > { %231 = vst.msk [vmem:[%s134_s24] sm:$0xff] %vm230_vm1, %v228_v23 }
 0x1b0   : > { %393 = shalt.err (!%p390_p3)
}
 0x1b1   : > { %320 = dma.vmem_to_hbm [thread:$0]  (%p483_p5), %s246_s25, 128, %s248_s26, %s233_s27  }
 0x1b2 PF: > { %p326_p4 = scmp.ge.s32.totalorder %s428_s12, 2  ;;  %s259_s6 = sand.u32 1, %s416_s9  }
 0x1b3   : > { %s260_s7 = scalar_lea.sflag [#allocation3], %s259_s6 }
 0x1b4   : > { %p323_p7 = pnand %p326_p4, %p487_p6 }
 0x1b6   : > { %p324_p8 = pneg %p323_p7 }
 0x1b8   : > { %411 = dma.done.wait (%p324_p8), %s260_s7, 128  }
 0x1b9   : > { %413 = vsyncadd (%p324_p8), %s260_s7, 4294967168  ;;  %p12_p9 = scmp.ge.s32.totalorder %s470_s15, 4   ;;  %s583_s9 = smov %s420_s10 }
 0x1ba   : > { %s584_s10 = smov %s424_s11  ;;  %s585_s11 = smov %s481_s18 }
 0x1bb   : > { %s586_s12 = smov %s470_s15  ;;  %14 = sbr.rel (!%p12_p9) target bundleno = 3 (0x3), region = 63 }
 0x1c0   :  { %266 = vsyncpa [#allocation3], 1 }
 0x1c1   :  { %268 = vsyncpa [#allocation3 + $0x1], 1 }

</bundles_post_ra>
